<compile_context>
chip_gen: v7x
topology: tpu7x:2x2x1
jax: 0.10.0
libtpu: 0.0.40
codegen_flags: <defaults>
</compile_context>

<pallas_src>
import functools

import jax
import jax.numpy as jnp
from jax import lax
from jax.experimental import pallas as pl
from jax.experimental.pallas import tpu as pltpu

OUT_SUB = 8                # out_dim (5) padded to one sublane group, not 128 lanes
MAX_TB = 2048              # max batch tile (lane axis of the transposed output)
VMEM_BUDGET = 12 << 20     # keep 2*(x_tile + out_tile) under v5e's 16 MiB default


def linear_kernel(w_ref, b_ref, x_ref, o_ref):
    # One MXU matmul + VPU bias add per batch tile; batch on the lane axis.
    acc = lax.dot_general(
        w_ref[...],                      # (OUT_SUB, D)   f32, zero-padded rows
        x_ref[...],                      # (TB, D)        f32
        dimension_numbers=(((1,), (1,)), ((), ())),
        preferred_element_type=jnp.float32,
    )                                    # -> (OUT_SUB, TB)
    o_ref[...] = acc + b_ref[...]        # (OUT_SUB, 1) bias broadcast over lanes


def prepare_params(weight, bias):
    """Pad nn.Linear params once at init time (not per forward call)."""
    out_dim, d = weight.shape
    w_pad = jnp.zeros((OUT_SUB, d), jnp.float32).at[:out_dim, :].set(weight)
    b_pad = jnp.zeros((OUT_SUB, 1), jnp.float32).at[:out_dim, 0].set(bias)
    return w_pad, b_pad


def _pick_tb(batch, d):
    """Batch-tile size: lane-dense, >=2 grid steps when possible, VMEM-safe."""
    if batch <= 128:
        return batch                     # single full-array block (exact dims)
    # VMEM cap: double-buffered x tile + out tile inside scoped-VMEM defaults.
    row_bytes = (d + OUT_SUB) * 4
    cap = max(128, (VMEM_BUDGET // 2 // row_bytes) // 128 * 128)
    half = -(-batch // 2)                # ceil(B / 2): >=2 steps for v7x's 2 TCs
    half = -(-half // 128) * 128         # round up to a multiple of 128 lanes
    return min(MAX_TB, cap, half)


@functools.partial(jax.jit, static_argnames=("out_dim",))
def torch_model_forward(x, w_pad, b_pad, out_dim=5):
    """Equivalent of TorchModel.forward(x, y=None).

    x:     (B, D) float32
    w_pad: (OUT_SUB, D) float32  (from prepare_params)
    b_pad: (OUT_SUB, 1) float32  (from prepare_params)
    returns (B, out_dim) float32
    """
    batch, d = x.shape
    tb = _pick_tb(batch, d)
    grid = (pl.cdiv(batch, tb),)

    out = pl.pallas_call(
        linear_kernel,
        out_shape=jax.ShapeDtypeStruct((OUT_SUB, batch), jnp.float32),
        grid=grid,
        in_specs=[
            pl.BlockSpec((OUT_SUB, d), lambda i: (0, 0)),    # weight: resident
            pl.BlockSpec((OUT_SUB, 1), lambda i: (0, 0)),    # bias:   resident
            pl.BlockSpec((tb, d), lambda i: (i, 0)),         # x: tiled over batch
        ],
        out_specs=pl.BlockSpec((OUT_SUB, tb), lambda i: (0, i)),
        compiler_params=pltpu.CompilerParams(
            dimension_semantics=("parallel",),               # v7x: 2-TC sharding
        ),
    )(w_pad, b_pad, x)

    # Ragged last batch tile computes garbage rows past B but they are dropped
    # at writeback (no in-kernel reduction over batch), so results are exact.
    # A fused consumer could read the (OUT_SUB, B) slab directly; to match
    # nn.Linear's (B, out_dim) output exactly, peel the real rows and transpose.
    return out[:out_dim, :].T


if __name__ == "__main__":
    # Deterministic synthetic parameters and inputs (no checkpoint load).
    input_size = 32
    batch = 8
    out_dim = 5

    key = jax.random.PRNGKey(0)
    kx, kw, kb = jax.random.split(key, 3)

    x = jax.random.normal(kx, (batch, input_size), dtype=jnp.float32)
    # nn.Linear(input_size, 5): weight (5, input_size), bias (5,)
    weight = jax.random.normal(kw, (out_dim, input_size), dtype=jnp.float32) * 0.1
    bias = jax.random.normal(kb, (out_dim,), dtype=jnp.float32) * 0.1

    w_pad, b_pad = prepare_params(weight, bias)
    y_pred = jax.block_until_ready(
        torch_model_forward(x, w_pad, b_pad, out_dim=out_dim)
    )

    # Reference check in plain JAX (same math as torch's nn.Linear).
    ref = x @ weight.T + bias
    assert y_pred.shape == (batch, out_dim)
    assert jnp.allclose(y_pred, ref, atol=1e-5, rtol=1e-5)

    # TODO(synk): CrossEntropyLoss branch (y is not None) and the unused
    # Softmax member are never exercised in the inference path, so omitted.
    print("KERNEL_OK")
</pallas_src>

<mosaic_0001>
module attributes {stable_mosaic.version = 11 : i64} {
  func.func @linear_kernel(%arg0: i32, %arg1: memref<8x32xf32, #tpu.memory_space<vmem>>, %arg2: memref<8x1xf32, #tpu.memory_space<vmem>>, %arg3: memref<8x32xf32, #tpu.memory_space<vmem>>, %arg4: memref<8x8xf32, #tpu.memory_space<vmem>>) attributes {dimension_semantics = [#tpu.dimension_semantics<parallel>], iteration_bounds = array<i64: 1>, scalar_prefetch = 0 : i64, scratch_operands = 0 : i64, tpu.core_type = #tpu.core_type<tc>, window_params = [{pipeline_mode = #tpu.pipeline_mode<synchronous>, transform_indices = @transform_0, window_bounds = array<i64: 8, 32>}, {pipeline_mode = #tpu.pipeline_mode<synchronous>, transform_indices = @transform_1, window_bounds = array<i64: 8, 1>}, {transform_indices = @transform_2, window_bounds = array<i64: 8, 32>}, {transform_indices = @transform_3, window_bounds = array<i64: 8, 8>}]} {
    %c0 = arith.constant 0 : index
    %c0_0 = arith.constant 0 : index
    %0 = vector.load %arg1[%c0, %c0_0] : memref<8x32xf32, #tpu.memory_space<vmem>>, vector<8x32xf32>
    %c0_1 = arith.constant 0 : index
    %c0_2 = arith.constant 0 : index
    %1 = vector.load %arg3[%c0_1, %c0_2] : memref<8x32xf32, #tpu.memory_space<vmem>>, vector<8x32xf32>
    %cst = arith.constant dense<0.000000e+00> : vector<8x8xf32>
    %2 = tpu.matmul %0, %1, %cst {dimension_numbers = #tpu.dot_dimension_numbers<[1], [1], [0], [0], [0, 0, 1, 0], [], []>} : vector<8x32xf32>, vector<8x32xf32>, vector<8x8xf32> -> vector<8x8xf32>
    %c0_3 = arith.constant 0 : index
    %c0_4 = arith.constant 0 : index
    %3 = vector.load %arg2[%c0_3, %c0_4] : memref<8x1xf32, #tpu.memory_space<vmem>>, vector<8x1xf32>
    %4 = vector.broadcast %3 : vector<8x1xf32> to vector<8x8xf32>
    %5 = arith.addf %2, %4 : vector<8x8xf32>
    %c0_5 = arith.constant 0 : index
    %c0_6 = arith.constant 0 : index
    %6 = vector.load %arg4[%c0_5, %c0_6] : memref<8x8xf32, #tpu.memory_space<vmem>>, vector<8x8xf32>
    tpu.vector_store %arg4[%c0_5, %c0_6], %5 {strides = array<i32>} : memref<8x8xf32, #tpu.memory_space<vmem>>, vector<8x8xf32>,
    return
  }
  func.func @transform_0(%arg0: i32) -> (i32, i32) {
    %c0_i32 = arith.constant 0 : i32
    %c0_i32_0 = arith.constant 0 : i32
    %c0_i32_1 = arith.constant 0 : i32
    return %c0_i32, %c0_i32_0 : i32, i32
  }
  func.func @transform_1(%arg0: i32) -> (i32, i32) {
    %c0_i32 = arith.constant 0 : i32
    %c0_i32_0 = arith.constant 0 : i32
    %c0_i32_1 = arith.constant 0 : i32
    return %c0_i32, %c0_i32_0 : i32, i32
  }
  func.func @transform_2(%arg0: i32) -> (i32, i32) {
    %c0_i32 = arith.constant 0 : i32
    %c0_i32_0 = arith.constant 0 : i32
    return %arg0, %c0_i32 : i32, i32
  }
  func.func @transform_3(%arg0: i32) -> (i32, i32) {
    %c0_i32 = arith.constant 0 : i32
    %c0_i32_0 = arith.constant 0 : i32
    return %c0_i32, %arg0 : i32, i32
  }
}

</mosaic_0001>

<bundles_post_ra>
// kernel: torch_model_forward.1
= control target key start
LH: loop header
LB: loop body
LE: loop exit
PB: predicated region body
PF: predicated region fallthrough
CT: control target
= control target key end

     0   :  { %8 = vsyncpa [#allocation3], 0  ;;  %s156_s12 = smov [#allocation2]   ;;  %s201_s0 = inlined_call_operand.vmem [shape: f32[8,32], index: 0, kind: input, shape index: {}]   ;;  %s202_s1 = inlined_call_operand.vmem [shape: f32[8,1], index: 1, kind: input, shape index: {}]   ;;  %s203_s2 = inlined_call_operand.hbm [shape: f32[8,32], index: 2, kind: input, shape index: {}]   ;;  %s204_s3 = inlined_call_operand.vmem [shape: f32[8,8], index: 3, kind: output, shape index: {}]  }
   0x1   :  { %s19_s13 = sshll.u32 %s156_s12, 4  ;;  %s132_s16 = scalar_lea.hbm %s203_s2, 128  ;;  %s20_s13 = int_to_ptr.vmem [resolvable:$true] %s19_s13 }
   0x2   :  { %p133_p0 = scmp.ne.s32.totalorder %s203_s2, %s132_s16  ;;  %p136_p1 = scmp.lt.u32.totalorder %s132_s16, %s203_s2 }
   0x4   :  { %p138_p2 = pnand %p136_p1, %p133_p0 }
   0x6   :  { %141 = shalt.err (!%p138_p2)
}
   0x7   :  { %s142_s21 = scalar_lea.vmem %s20_s13, 128  ;;  %p147_p4 = scmp.lt.s32.totalorder %s20_s13, %s20_s13 }
   0x8   :  { %p143_p3 = scmp.ne.s32.totalorder %s20_s13, %s142_s21  ;;  %p148_p5 = scmp.lt.s32.totalorder %s142_s21, %s142_s21 }
   0xa   :  { %p149_p6 = por %p148_p5, %p147_p4 }
   0xc   :  { %p150_p7 = pnand %p149_p6, %p143_p3 }
   0xe   :  { %153 = shalt.err (!%p150_p7)
}
   0xf   :  { %22 = dma.hbm_to_vmem [thread:$0]  %s203_s2, 128, %s20_s13, [#allocation3]  }
  0x10   :  { %154 = dma.done.wait [#allocation3], 128  }
  0x11   :  { %155 = vsyncadd [#allocation3], 4294967168  ;;  %v157_v0 = vmov 0.0   ;;  %vm158_vm0 = vmmov 0   ;;  %v159_v1 = vmov 0   ;;  %vm34_vm1 = vcmask 261120  }
  0x12   :  { %122 = vmatprep.subr.mxu0 %v157_v0  ;;  %124 = vmatprep.mubr.msk.f32.mxu0 %vm158_vm0, %v157_v0  ;;  %v27_v2 = vld [vmem:[#allocation2] sm:$0xff]  ;;  %vm111_vm2 = vcmask 64512  }
  0x13   :  { %131 = vset.pattern.permute.xlu0 %v159_v1  ;;  %v28_v3 = vld [vmem:[%s202_s1] sm:$0xff]  ;;  %123 = vmatpush3.xpose.msk.msra.mxu0 %vm34_vm1, %v27_v2 }
  0x14   :  { %v26_v4 = vld [vmem:[%s201_s0] sm:$0xff]  ;;  %31 = vperm.xlu0 %131, %v28_v3  }
  0x16   :  { %125 = vmatmul.mubr.msk.f32.vlgmr.msra.gmra.mrb[0].mxu0 %vm34_vm1, %v26_v4 }
  0x93   :  { %v32_v5 = vpop.permute.xlu0 %31 }
  0xe9   :  { %v107_v6 = vpop.f32.mrb[0].mxu0 }
  0xea   :  { %v108_v7 = vadd.f32 %v107_v6, %v32_v5  ;;  %v126_v8 = vpop.f32.mrb[1].mxu0 }
  0xec   :  { %112 = vst.msk [vmem:[%s204_s3] sm:$0xff] %vm111_vm2, %v108_v7 }
  0xed   :  { %117 = vsyncpa [#allocation3], 1 }

</bundles_post_ra>
